<compile_context>
chip_gen: v7x
topology: tpu7x:2x2x1
jax: 0.10.0
libtpu: 0.0.40
codegen_flags: <defaults>
</compile_context>

<pallas_src>
import functools

import jax
import jax.numpy as jnp
from jax.experimental import pallas as pl
from jax.experimental.pallas import tpu as pltpu

_LANE = 128            # lane tile
_MAX_BLOCK_ROWS = 4096 # 4096x128 f32 = 2 MiB/stream-buffer; 4 streams x 2 bufs = 16 MiB
_SQRT2 = 1.4142135623730951

# Eigen / XLA(chlo) f32 erf rational approximation: erf(t) ~= t * P(t^2) / Q(t^2)
# with t clamped to [-4, 4].  Absolute error ~1e-7; same approximation XLA uses
# to expand erf for f32.  Q(t^2) is strictly negative on [0, 16] (all betas < 0),
# so Qa*Qb > 0 and its reciprocal is well defined.
_ERF_ALPHA = (-2.72614225801306e-10, 2.77068142495902e-08, -2.10102402082508e-06,
              -5.69250639462346e-05, -7.34990630326855e-04, -2.95459980854025e-03,
              -1.60960333262415e-02)
_ERF_BETA = (-1.45660718464996e-05, -2.13374055278905e-04, -1.68282697438203e-03,
             -7.37332916720468e-03, -1.42647390514189e-02)


def _recip_f32(y):
    """1/y without a full divide: EUP seed + one Newton-Raphson step (~1 ulp f32)."""
    r = pl.reciprocal(y, approx=True)   # EUP vrcp seed, ~12-bit
    return r * (2.0 - y * r)            # NR refinement: 3 cheap VPU ops


def _erf_pq(t):
    """Numerator/denominator polynomials of the rational erf, evaluated at t."""
    t2 = t * t
    p = jnp.float32(_ERF_ALPHA[0])
    for c in _ERF_ALPHA[1:]:
        p = p * t2 + jnp.float32(c)
    q = jnp.float32(_ERF_BETA[0])
    for c in _ERF_BETA[1:]:
        q = q * t2 + jnp.float32(c)
    return p, q


def _bits_tile(x, mean, scale, half_q, x_min=None, x_max=None):
    """Elementwise bits for one VMEM tile.  x_min/x_max=None <=> use_clamp=False."""
    x = x.astype(jnp.float32)
    mean = mean.astype(jnp.float32)
    scale = scale.astype(jnp.float32)
    if x_min is not None:                        # use_clamp branch (static)
        x = jnp.clip(x, x_min, x_max)
    scale = jnp.maximum(scale, 1e-9)             # torch.clamp(scale, min=1e-9)

    inv = _recip_f32(scale * _SQRT2)             # no divide
    z = (x - mean) * inv
    delta = half_q * inv                         # >= 0

    a = jnp.clip(z + delta, -4.0, 4.0)
    b = jnp.clip(z - delta, -4.0, 4.0)
    pa, qa = _erf_pq(a)
    pb, qb = _erf_pq(b)
    # erf(a)-erf(b) = a*Pa/Qa - b*Pb/Qb = (a*Pa*Qb - b*Pb*Qa) * recip(Qa*Qb):
    # one reciprocal instead of two divides.  Qa,Qb < 0 always => Qa*Qb > 0.
    num = a * pa * qb - b * pb * qa
    d = num * _recip_f32(qa * qb)
    # d >= -~4e-7 (delta >= 0, clipped rational erf is near-monotone); the 2e-6
    # floor absorbs that, so no jnp.abs is needed.
    d = jnp.maximum(d, 2e-6)
    # likelihood = 0.5*d, floored at 1e-6; bits = -log2(0.5*d) = 1 - log2(d).
    return 1.0 - jnp.log2(d)


def _entropy_kernel_clamp(params_ref, x_ref, mean_ref, scale_ref, bits_ref, *, half_q):
    # params (SMEM): [x_min, x_max]
    bits_ref[...] = _bits_tile(x_ref[...], mean_ref[...], scale_ref[...],
                               half_q, params_ref[0], params_ref[1])


def _entropy_kernel_noclamp(x_ref, mean_ref, scale_ref, bits_ref, *, half_q):
    bits_ref[...] = _bits_tile(x_ref[...], mean_ref[...], scale_ref[...], half_q)


def _bits_jax(x, mean, scale, half_q, x_min=None, x_max=None):
    """Tiny pure-JAX epilogue for the <128-element ragged tail (exact semantics)."""
    x = x.astype(jnp.float32)
    mean = mean.astype(jnp.float32)
    scale = jnp.maximum(scale.astype(jnp.float32), 1e-9)
    if x_min is not None:
        x = jnp.clip(x, x_min, x_max)
    inv = 1.0 / (scale * _SQRT2)
    z = (x - mean) * inv
    dl = half_q * inv
    lik = 0.5 * jnp.abs(jax.scipy.special.erf(z + dl) - jax.scipy.special.erf(z - dl))
    return -jnp.log2(jnp.maximum(lik, 1e-6))


@functools.partial(jax.jit, static_argnames=("Q", "use_clamp"))
def entropy_gaussian_bits(x, mean, scale, Q=1.0, x_mean=None, use_clamp=True):
    """JAX/Pallas equivalent of Entropy_gaussian.forward. Returns bits, same shape as x."""
    orig_shape = x.shape
    total = x.size
    half_q = float(0.5 * Q)

    if use_clamp:
        # When x_mean is None this is one inherent extra HBM read of x for the
        # global mean (accumulated in f32, no materialized f32 copy of x).
        # Callers that know x_mean should pass it to skip this pass.
        xm = jnp.mean(x, dtype=jnp.float32) if x_mean is None else jnp.asarray(x_mean, jnp.float32)
        x_min = xm - jnp.float32(15000.0 * Q)
        x_max = xm + jnp.float32(15000.0 * Q)
    else:
        x_min = x_max = None

    x_flat = x.reshape(-1)
    m_flat = mean.reshape(-1)
    s_flat = scale.reshape(-1)

    rows = total // _LANE
    body_n = rows * _LANE
    tail = total - body_n

    pieces = []
    if rows:
        # Lane-dense (rows, 128) view of the aligned body -- copy-free when the
        # total is a multiple of 128 (the common case).
        xb = x_flat[:body_n].reshape(rows, _LANE)
        mb = m_flat[:body_n].reshape(rows, _LANE)
        sb = s_flat[:body_n].reshape(rows, _LANE)

        if rows > _MAX_BLOCK_ROWS:
            block_rows = _MAX_BLOCK_ROWS
        elif rows >= 16:
            # Guarantee >= 2 grid steps (rounded up to a multiple of 8 rows) so
            # dimension_semantics=("parallel",) can shard across v7x's 2 TCs.
            block_rows = ((pl.cdiv(rows, 2) + 7) // 8) * 8
        else:
            block_rows = rows    # block == full dim: any row count is allowed
        grid = (pl.cdiv(rows, block_rows),)
        tile = pl.BlockSpec((block_rows, _LANE), lambda i: (i, 0))

        if use_clamp:
            # Two loop-invariant scalars in SMEM; 8 bytes, negligible even if the
            # compiler re-copies them per grid step (hardware-validated path).
            params = jnp.stack([x_min, x_max]).astype(jnp.float32)
            kernel = functools.partial(_entropy_kernel_clamp, half_q=half_q)
            in_specs = [pl.BlockSpec(memory_space=pltpu.MemorySpace.SMEM),
                        tile, tile, tile]
            args = (params, xb, mb, sb)
        else:
            kernel = functools.partial(_entropy_kernel_noclamp, half_q=half_q)
            in_specs = [tile, tile, tile]
            args = (xb, mb, sb)

        bits_body = pl.pallas_call(
            kernel,
            out_shape=jax.ShapeDtypeStruct((rows, _LANE), jnp.float32),
            grid_spec=pl.GridSpec(grid=grid, in_specs=in_specs, out_specs=tile),
            compiler_params=pltpu.CompilerParams(
                dimension_semantics=("parallel",),
                vmem_limit_bytes=40 << 20),
        )(*args)
        pieces.append(bits_body.reshape(-1))

    if tail:
        # <128-element ragged tail: tiny pure-JAX epilogue instead of padding
        # (padding would push all three inputs + the output through HBM again).
        pieces.append(_bits_jax(x_flat[body_n:], m_flat[body_n:], s_flat[body_n:],
                                half_q, x_min, x_max))

    bits = pieces[0] if len(pieces) == 1 else jnp.concatenate(pieces)
    return bits.reshape(orig_shape)


def _reference(x, mean, scale, Q=1.0, use_clamp=True):
    """Pure-JAX reference mirroring the PyTorch forward. Returns (bits, likelihood)."""
    x = x.astype(jnp.float32)
    mean = mean.astype(jnp.float32)
    scale = scale.astype(jnp.float32)
    if use_clamp:
        x_mean = jnp.mean(x)
        x = jnp.clip(x, x_mean - 15000.0 * Q, x_mean + 15000.0 * Q)
    scale = jnp.maximum(scale, 1e-9)
    cdf = lambda v: 0.5 * (1.0 + jax.scipy.special.erf((v - mean) / (scale * _SQRT2)))
    lik = jnp.abs(cdf(x + 0.5 * Q) - cdf(x - 0.5 * Q))
    lik = jnp.maximum(lik, 1e-6)
    return -jnp.log2(lik), lik


if __name__ == "__main__":
    # Small NCHW-shaped inputs, consistent with per-element latent coding:
    # x, mean, scale all of shape (B, C, H, W).  Total = 2048 = 16 * 128, so the
    # copy-free lane-aligned path is exercised with a 2-step grid.
    B, C, H, W = 2, 4, 16, 16
    key = jax.random.PRNGKey(0)
    k1, k2, k3 = jax.random.split(key, 3)
    x = jax.random.normal(k1, (B, C, H, W), dtype=jnp.float32) * 3.0
    mean = jax.random.normal(k2, (B, C, H, W), dtype=jnp.float32)
    scale = jnp.abs(jax.random.normal(k3, (B, C, H, W), dtype=jnp.float32)) + 0.1

    bits = entropy_gaussian_bits(x, mean, scale, Q=1.0)
    bits = jax.block_until_ready(bits)

    ref_bits, ref_lik = _reference(x, mean, scale, Q=1.0)
    assert bits.shape == (B, C, H, W)
    assert bool(jnp.all(jnp.isfinite(bits)))

    err = jnp.abs(bits - ref_bits)
    # Tight check where the likelihood is well above the catastrophic-cancellation
    # regime: the kernel must agree with the erf-based reference closely.
    safe = ref_lik > 1e-3
    max_err_safe = float(jnp.max(jnp.where(safe, err, 0.0)))
    # Loose check everywhere: near the 1e-6 Low_bound floor the likelihood is the
    # f32 difference of two CDFs ~1.0, so -log2 amplifies ulp-level differences
    # between any two correct f32 erf implementations to O(0.1) bits.  Inherent
    # to the module's formulation, not a kernel bug.
    max_err_all = float(jnp.max(err))
    assert max_err_safe < 5e-3, ("safe-region mismatch", max_err_safe)
    assert max_err_all < 0.75, ("tail mismatch", max_err_all)

    # Ragged-total path: lane-aligned body through the kernel + tiny JAX tail.
    xr = jax.random.normal(k1, (2, 3, 47), dtype=jnp.float32)
    mr = jax.random.normal(k2, (2, 3, 47), dtype=jnp.float32)
    sr = jnp.abs(jax.random.normal(k3, (2, 3, 47), dtype=jnp.float32)) + 0.2
    bits_r = jax.block_until_ready(entropy_gaussian_bits(xr, mr, sr, Q=1.0))
    ref_r, lik_r = _reference(xr, mr, sr, Q=1.0)
    err_r = jnp.abs(bits_r - ref_r)
    safe_r = lik_r > 1e-3
    assert bits_r.shape == (2, 3, 47)
    assert bool(jnp.all(jnp.isfinite(bits_r)))
    assert float(jnp.max(jnp.where(safe_r, err_r, 0.0))) < 5e-3
    assert float(jnp.max(err_r)) < 0.75

    print("KERNEL_OK")
</pallas_src>

<mosaic_0001>
module attributes {stable_mosaic.version = 11 : i64} {
  func.func @_entropy_kernel_clamp(%arg0: i32, %arg1: memref<2xf32, #tpu.memory_space<smem>>, %arg2: memref<8x128xf32, #tpu.memory_space<vmem>>, %arg3: memref<8x128xf32, #tpu.memory_space<vmem>>, %arg4: memref<8x128xf32, #tpu.memory_space<vmem>>, %arg5: memref<8x128xf32, #tpu.memory_space<vmem>>) attributes {dimension_semantics = [#tpu.dimension_semantics<parallel>], iteration_bounds = array<i64: 2>, scalar_prefetch = 0 : i64, scratch_operands = 0 : i64, tpu.core_type = #tpu.core_type<tc>, window_params = [{transform_indices = @transform_0, window_bounds = array<i64: 2>}, {transform_indices = @transform_1, window_bounds = array<i64: 8, 128>}, {transform_indices = @transform_2, window_bounds = array<i64: 8, 128>}, {transform_indices = @transform_3, window_bounds = array<i64: 8, 128>}, {transform_indices = @transform_4, window_bounds = array<i64: 8, 128>}]} {
    %c0 = arith.constant 0 : index
    %c0_0 = arith.constant 0 : index
    %0 = vector.load %arg2[%c0, %c0_0] : memref<8x128xf32, #tpu.memory_space<vmem>>, vector<8x128xf32>
    %c0_1 = arith.constant 0 : index
    %c0_2 = arith.constant 0 : index
    %1 = vector.load %arg3[%c0_1, %c0_2] : memref<8x128xf32, #tpu.memory_space<vmem>>, vector<8x128xf32>
    %c0_3 = arith.constant 0 : index
    %c0_4 = arith.constant 0 : index
    %2 = vector.load %arg4[%c0_3, %c0_4] : memref<8x128xf32, #tpu.memory_space<vmem>>, vector<8x128xf32>
    %c0_5 = arith.constant 0 : index
    %3 = memref.load %arg1[%c0_5] : memref<2xf32, #tpu.memory_space<smem>>
    %c1 = arith.constant 1 : index
    %4 = memref.load %arg1[%c1] : memref<2xf32, #tpu.memory_space<smem>>
    %5 = vector.broadcast %3 : f32 to vector<8x128xf32>
    %6 = arith.maximumf %5, %0 : vector<8x128xf32>
    %7 = vector.broadcast %4 : f32 to vector<8x128xf32>
    %8 = arith.minimumf %7, %6 : vector<8x128xf32>
    %cst = arith.constant 9.99999971E-10 : f32
    %9 = vector.broadcast %cst : f32 to vector<8x128xf32>
    %10 = arith.maximumf %2, %9 : vector<8x128xf32>
    %cst_6 = arith.constant 1.41421354 : f32
    %11 = vector.broadcast %cst_6 : f32 to vector<8x128xf32>
    %12 = arith.mulf %10, %11 : vector<8x128xf32>
    %13 = tpu.reciprocal %12 {approx = true} : vector<8x128xf32> -> vector<8x128xf32>
    %14 = arith.mulf %12, %13 : vector<8x128xf32>
    %cst_7 = arith.constant 2.000000e+00 : f32
    %15 = vector.broadcast %cst_7 : f32 to vector<8x128xf32>
    %16 = arith.subf %15, %14 : vector<8x128xf32>
    %17 = arith.mulf %13, %16 : vector<8x128xf32>
    %18 = arith.subf %8, %1 : vector<8x128xf32>
    %19 = arith.mulf %18, %17 : vector<8x128xf32>
    %cst_8 = arith.constant 5.000000e-01 : f32
    %20 = vector.broadcast %cst_8 : f32 to vector<8x128xf32>
    %21 = arith.mulf %20, %17 : vector<8x128xf32>
    %22 = arith.addf %19, %21 : vector<8x128xf32>
    %cst_9 = arith.constant -4.000000e+00 : f32
    %cst_10 = arith.constant 4.000000e+00 : f32
    %23 = vector.broadcast %cst_9 : f32 to vector<8x128xf32>
    %24 = arith.maximumf %23, %22 : vector<8x128xf32>
    %25 = vector.broadcast %cst_10 : f32 to vector<8x128xf32>
    %26 = arith.minimumf %25, %24 : vector<8x128xf32>
    %27 = arith.subf %19, %21 : vector<8x128xf32>
    %cst_11 = arith.constant -4.000000e+00 : f32
    %cst_12 = arith.constant 4.000000e+00 : f32
    %28 = vector.broadcast %cst_11 : f32 to vector<8x128xf32>
    %29 = arith.maximumf %28, %27 : vector<8x128xf32>
    %30 = vector.broadcast %cst_12 : f32 to vector<8x128xf32>
    %31 = arith.minimumf %30, %29 : vector<8x128xf32>
    %32 = arith.mulf %26, %26 : vector<8x128xf32>
    %cst_13 = arith.constant -2.72614237E-10 : f32
    %33 = vector.broadcast %cst_13 : f32 to vector<8x128xf32>
    %34 = arith.mulf %33, %32 : vector<8x128xf32>
    %cst_14 = arith.constant 2.77068146E-8 : f32
    %35 = vector.broadcast %cst_14 : f32 to vector<8x128xf32>
    %36 = arith.addf %34, %35 : vector<8x128xf32>
    %37 = arith.mulf %36, %32 : vector<8x128xf32>
    %cst_15 = arith.constant -2.10102394E-6 : f32
    %38 = vector.broadcast %cst_15 : f32 to vector<8x128xf32>
    %39 = arith.addf %37, %38 : vector<8x128xf32>
    %40 = arith.mulf %39, %32 : vector<8x128xf32>
    %cst_16 = arith.constant -5.69250624E-5 : f32
    %41 = vector.broadcast %cst_16 : f32 to vector<8x128xf32>
    %42 = arith.addf %40, %41 : vector<8x128xf32>
    %43 = arith.mulf %42, %32 : vector<8x128xf32>
    %cst_17 = arith.constant -7.34990637E-4 : f32
    %44 = vector.broadcast %cst_17 : f32 to vector<8x128xf32>
    %45 = arith.addf %43, %44 : vector<8x128xf32>
    %46 = arith.mulf %45, %32 : vector<8x128xf32>
    %cst_18 = arith.constant -2.954600e-03 : f32
    %47 = vector.broadcast %cst_18 : f32 to vector<8x128xf32>
    %48 = arith.addf %46, %47 : vector<8x128xf32>
    %49 = arith.mulf %48, %32 : vector<8x128xf32>
    %cst_19 = arith.constant -0.0160960332 : f32
    %50 = vector.broadcast %cst_19 : f32 to vector<8x128xf32>
    %51 = arith.addf %49, %50 : vector<8x128xf32>
    %cst_20 = arith.constant -1.45660715E-5 : f32
    %52 = vector.broadcast %cst_20 : f32 to vector<8x128xf32>
    %53 = arith.mulf %52, %32 : vector<8x128xf32>
    %cst_21 = arith.constant -2.13374049E-4 : f32
    %54 = vector.broadcast %cst_21 : f32 to vector<8x128xf32>
    %55 = arith.addf %53, %54 : vector<8x128xf32>
    %56 = arith.mulf %55, %32 : vector<8x128xf32>
    %cst_22 = arith.constant -0.00168282702 : f32
    %57 = vector.broadcast %cst_22 : f32 to vector<8x128xf32>
    %58 = arith.addf %56, %57 : vector<8x128xf32>
    %59 = arith.mulf %58, %32 : vector<8x128xf32>
    %cst_23 = arith.constant -0.00737332925 : f32
    %60 = vector.broadcast %cst_23 : f32 to vector<8x128xf32>
    %61 = arith.addf %59, %60 : vector<8x128xf32>
    %62 = arith.mulf %61, %32 : vector<8x128xf32>
    %cst_24 = arith.constant -0.0142647391 : f32
    %63 = vector.broadcast %cst_24 : f32 to vector<8x128xf32>
    %64 = arith.addf %62, %63 : vector<8x128xf32>
    %65 = arith.mulf %31, %31 : vector<8x128xf32>
    %cst_25 = arith.constant -2.72614237E-10 : f32
    %66 = vector.broadcast %cst_25 : f32 to vector<8x128xf32>
    %67 = arith.mulf %66, %65 : vector<8x128xf32>
    %cst_26 = arith.constant 2.77068146E-8 : f32
    %68 = vector.broadcast %cst_26 : f32 to vector<8x128xf32>
    %69 = arith.addf %67, %68 : vector<8x128xf32>
    %70 = arith.mulf %69, %65 : vector<8x128xf32>
    %cst_27 = arith.constant -2.10102394E-6 : f32
    %71 = vector.broadcast %cst_27 : f32 to vector<8x128xf32>
    %72 = arith.addf %70, %71 : vector<8x128xf32>
    %73 = arith.mulf %72, %65 : vector<8x128xf32>
    %cst_28 = arith.constant -5.69250624E-5 : f32
    %74 = vector.broadcast %cst_28 : f32 to vector<8x128xf32>
    %75 = arith.addf %73, %74 : vector<8x128xf32>
    %76 = arith.mulf %75, %65 : vector<8x128xf32>
    %cst_29 = arith.constant -7.34990637E-4 : f32
    %77 = vector.broadcast %cst_29 : f32 to vector<8x128xf32>
    %78 = arith.addf %76, %77 : vector<8x128xf32>
    %79 = arith.mulf %78, %65 : vector<8x128xf32>
    %cst_30 = arith.constant -2.954600e-03 : f32
    %80 = vector.broadcast %cst_30 : f32 to vector<8x128xf32>
    %81 = arith.addf %79, %80 : vector<8x128xf32>
    %82 = arith.mulf %81, %65 : vector<8x128xf32>
    %cst_31 = arith.constant -0.0160960332 : f32
    %83 = vector.broadcast %cst_31 : f32 to vector<8x128xf32>
    %84 = arith.addf %82, %83 : vector<8x128xf32>
    %cst_32 = arith.constant -1.45660715E-5 : f32
    %85 = vector.broadcast %cst_32 : f32 to vector<8x128xf32>
    %86 = arith.mulf %85, %65 : vector<8x128xf32>
    %cst_33 = arith.constant -2.13374049E-4 : f32
    %87 = vector.broadcast %cst_33 : f32 to vector<8x128xf32>
    %88 = arith.addf %86, %87 : vector<8x128xf32>
    %89 = arith.mulf %88, %65 : vector<8x128xf32>
    %cst_34 = arith.constant -0.00168282702 : f32
    %90 = vector.broadcast %cst_34 : f32 to vector<8x128xf32>
    %91 = arith.addf %89, %90 : vector<8x128xf32>
    %92 = arith.mulf %91, %65 : vector<8x128xf32>
    %cst_35 = arith.constant -0.00737332925 : f32
    %93 = vector.broadcast %cst_35 : f32 to vector<8x128xf32>
    %94 = arith.addf %92, %93 : vector<8x128xf32>
    %95 = arith.mulf %94, %65 : vector<8x128xf32>
    %cst_36 = arith.constant -0.0142647391 : f32
    %96 = vector.broadcast %cst_36 : f32 to vector<8x128xf32>
    %97 = arith.addf %95, %96 : vector<8x128xf32>
    %98 = arith.mulf %26, %51 : vector<8x128xf32>
    %99 = arith.mulf %98, %97 : vector<8x128xf32>
    %100 = arith.mulf %31, %84 : vector<8x128xf32>
    %101 = arith.mulf %100, %64 : vector<8x128xf32>
    %102 = arith.subf %99, %101 : vector<8x128xf32>
    %103 = arith.mulf %64, %97 : vector<8x128xf32>
    %104 = tpu.reciprocal %103 {approx = true} : vector<8x128xf32> -> vector<8x128xf32>
    %105 = arith.mulf %103, %104 : vector<8x128xf32>
    %cst_37 = arith.constant 2.000000e+00 : f32
    %106 = vector.broadcast %cst_37 : f32 to vector<8x128xf32>
    %107 = arith.subf %106, %105 : vector<8x128xf32>
    %108 = arith.mulf %104, %107 : vector<8x128xf32>
    %109 = arith.mulf %102, %108 : vector<8x128xf32>
    %cst_38 = arith.constant 2.000000e-06 : f32
    %110 = vector.broadcast %cst_38 : f32 to vector<8x128xf32>
    %111 = arith.maximumf %109, %110 : vector<8x128xf32>
    %112 = math.log %111 : vector<8x128xf32>
    %cst_39 = arith.constant 2.000000e+00 : f32
    %113 = math.log %cst_39 : f32
    %114 = vector.broadcast %113 : f32 to vector<8x128xf32>
    %115 = arith.divf %112, %114 : vector<8x128xf32>
    %cst_40 = arith.constant 1.000000e+00 : f32
    %116 = vector.broadcast %cst_40 : f32 to vector<8x128xf32>
    %117 = arith.subf %116, %115 : vector<8x128xf32>
    %c0_41 = arith.constant 0 : index
    %c0_42 = arith.constant 0 : index
    %118 = vector.load %arg5[%c0_41, %c0_42] : memref<8x128xf32, #tpu.memory_space<vmem>>, vector<8x128xf32>
    tpu.vector_store %arg5[%c0_41, %c0_42], %117 {strides = array<i32>} : memref<8x128xf32, #tpu.memory_space<vmem>>, vector<8x128xf32>,
    return
  }
  func.func @transform_0(%arg0: i32) -> i32 {
    %c0_i32 = arith.constant 0 : i32
    %c0_i32_0 = arith.constant 0 : i32
    return %c0_i32 : i32
  }
  func.func @transform_1(%arg0: i32) -> (i32, i32) {
    %c0_i32 = arith.constant 0 : i32
    %c0_i32_0 = arith.constant 0 : i32
    return %arg0, %c0_i32 : i32, i32
  }
  func.func @transform_2(%arg0: i32) -> (i32, i32) {
    %c0_i32 = arith.constant 0 : i32
    %c0_i32_0 = arith.constant 0 : i32
    return %arg0, %c0_i32 : i32, i32
  }
  func.func @transform_3(%arg0: i32) -> (i32, i32) {
    %c0_i32 = arith.constant 0 : i32
    %c0_i32_0 = arith.constant 0 : i32
    return %arg0, %c0_i32 : i32, i32
  }
  func.func @transform_4(%arg0: i32) -> (i32, i32) {
    %c0_i32 = arith.constant 0 : i32
    %c0_i32_0 = arith.constant 0 : i32
    return %arg0, %c0_i32 : i32, i32
  }
}

</mosaic_0001>

<bundles_post_ra>
// kernel: entropy_gaussian_bits.1
= control target key start
LH: loop header
LB: loop body
LE: loop exit
PB: predicated region body
PF: predicated region fallthrough
CT: control target
= control target key end

     0   :  { %9 = vsyncpa [#allocation3], 0  ;;  %s508_s15 = smov 0   ;;  %s551_s0 = inlined_call_operand.vmem [shape: f32[2], index: 0, kind: input, shape index: {}]   ;;  %s552_s1 = inlined_call_operand.vmem [shape: f32[16,128], index: 1, kind: input, shape index: {}]   ;;  %s553_s2 = inlined_call_operand.vmem [shape: f32[16,128], index: 2, kind: input, shape index: {}]   ;;  %s554_s3 = inlined_call_operand.vmem [shape: f32[16,128], index: 3, kind: input, shape index: {}]   ;;  %s555_s4 = inlined_call_operand.vmem [shape: f32[16,128], index: 4, kind: output, shape index: {}]  }
   0x1 LB: > { %s414_s16 = sadd.s32 4294967295, %s480_s15   ;;  %p416_p0 = scmp.ge.s32.totalorder %s480_s15, 1  ;;  %s480_s15 = sphi %s508_s15, %s15_s15  }
   0x2   : > { %p145_p1 = scmp.lt.s32.totalorder %s480_s15, 3  ;;  %s158_s19 = sshll.u32 %s551_s0, 4  ;;  %s159_s19 = int_to_ptr.vmem [resolvable:$true] %s158_s19 }
   0x3   : > { %p438_p3 = scmp.eq.s32.totalorder %s414_s16, 0  ;;  %s455_s21 = scalar_lea.vmem %s159_s19, 16 }
   0x4   : > { %p519_p2 = pnand %p416_p0, %p145_p1  ;;  %p456_p6 = scmp.ne.s32.totalorder %s159_s19, %s455_s21 }
   0x5   : > { %p463_p10 = scmp.lt.s32.totalorder %s159_s19, %s159_s19  ;;  %p464_p11 = scmp.lt.s32.totalorder %s455_s21, %s455_s21 }
   0x6   : > { %p434_p4 = pneg %p519_p2 }
   0x7   : > { %p465_p12 = por %p464_p11, %p463_p10 }
   0x8   : > { %p435_p5 = pnand %p438_p3, %p434_p4 }
   0xa   : > { %p457_p7 = pneg %p435_p5 }
   0xc   : > { %p458_p8 = pnand %p457_p7, %p456_p6 }
   0xe   : > { %p459_p9 = pneg %p458_p8 }
  0x10   : > { %p466_p13 = pnand %p465_p12, %p459_p9 }
  0x12   : > { %469 = shalt.err (!%p466_p13)
}
  0x13   : > { %s482_s22 = smov [#allocation2]   ;;  %192 = sbr.rel (%p519_p2) target bundleno = 122 (0x7a), region = 36 }
  0x14   : > { %437 = dma.vmem_to_smem (!%p435_p5), %s159_s19, 16, %s482_s22, [#allocation3]  }
  0x1a   : > { %475 = dma.done.wait (%p438_p3), [#allocation3], 16  }
  0x1b   : > { %477 = vsyncadd (%p438_p3), [#allocation3], 4294967280 }
  0x1c   : > { %198 = sfence }
  0x1d   : > { %p225_p0 = scmp.lt.s32.totalorder %s414_s16, 1  ;;  %s244_s27 = sld [smem:[#allocation2]] }
  0x1e   : > { %s425_s28 = sld [smem:[#allocation2 + $0x1]] }
  0x1f   : > { %s558_s16 = smov (!%p225_p0, %s414_s16), 1 }
  0x20   : > { %s530_s23 = sshll.u32 %s558_s16, 3 }
  0x21   : > { %s236_s26 = scalar_lea.vmem %s554_s3, %s530_s23  ;;  %s228_s5 = scalar_lea.vmem %s552_s1, %s530_s23 }
  0x22   : > { %v243_v0 = vld [vmem:[%s236_s26] sm:$0xff]  ;;  %s232_s8 = scalar_lea.vmem %s553_s2, %s530_s23  ;;  %s240_s11 = scalar_lea.vmem %s555_s4, %s530_s23 }
  0x23   : > { %v250_v1 = vmax.f32 %v243_v0, 1e-09  ;;  %v241_v3 = vld [vmem:[%s228_s5] sm:$0xff]  ;;  %v246_v4 = vstv %s244_s27 }
  0x24   : > { %v247_v5 = vmax.f32 %v246_v4, %v241_v3  ;;  %v248_v6 = vstv %s425_s28  ;;  %v242_v9 = vld [vmem:[%s232_s8] sm:$0xff] }
  0x25   : > { %v251_v2 = vmul.f32 1.4142135, %v250_v1 }
  0x26   : > { %v249_v7 = vmin.f32 %v248_v6, %v247_v5 }
  0x27   : > { %449 = vrcp.f32 %v251_v2 }
  0x28   : > { %v256_v12 = vsub.f32 %v249_v7, %v242_v9 }
  0x31   : > { %v450_v8 = vpop.eup %449 }
  0x32   : > { %v253_v10 = vmul.f32 %v450_v8, %v251_v2 }
  0x34   : > { %v254_v11 = vsub.f32 2.0, %v253_v10 }
  0x36   : > { %v255_v13 = vmul.f32 %v450_v8, %v254_v11 }
  0x38   : > { %v257_v14 = vmul.f32 %v256_v12, %v255_v13  ;;  %v258_v15 = vmul.f32 0.5, %v255_v13 }
  0x3a   : > { %v259_v16 = vadd.f32 %v258_v15, %v257_v14  ;;  %v262_v17 = vsub.f32 %v257_v14, %v258_v15 }
  0x3c   : > { %v426_v18 = vclamps-f32 %v259_v16, 4.0  ;;  %v427_v19 = vclamps-f32 %v262_v17, 4.0 }
  0x3e   : > { %v265_v20 = vmul.f32 %v426_v18, %v426_v18  ;;  %v286_v21 = vmul.f32 %v427_v19, %v427_v19 }
  0x40   : > { %v266_v22 = vmul.f32 -2.7261424e-10, %v265_v20  ;;  %v278_v23 = vmul.f32 -1.45660715e-05, %v265_v20  ;;  %v287_v24 = vmul.f32 -2.7261424e-10, %v286_v21 }
  0x41   : > { %v299_v25 = vmul.f32 -1.45660715e-05, %v286_v21 }
  0x42   : > { %v267_v26 = vadd.f32 2.7706815e-08, %v266_v22  ;;  %v279_v27 = vadd.f32 -0.00021337405, %v278_v23  ;;  %v288_v28 = vadd.f32 2.7706815e-08, %v287_v24 }
  0x43   : > { %v300_v29 = vadd.f32 -0.00021337405, %v299_v25 }
  0x44   : > { %v268_v30 = vmul.f32 %v267_v26, %v265_v20  ;;  %v280_v31 = vmul.f32 %v279_v27, %v265_v20  ;;  %v289_v32 = vmul.f32 %v288_v28, %v286_v21 }
  0x45   : > { %v301_v33 = vmul.f32 %v300_v29, %v286_v21 }
  0x46   : > { %v269_v34 = vadd.f32 -2.101024e-06, %v268_v30  ;;  %v281_v35 = vadd.f32 -0.001682827, %v280_v31  ;;  %v290_v36 = vadd.f32 -2.101024e-06, %v289_v32 }
  0x47   : > { %v302_v37 = vadd.f32 -0.001682827, %v301_v33 }
  0x48   : > { %v270_v38 = vmul.f32 %v269_v34, %v265_v20  ;;  %v282_v39 = vmul.f32 %v281_v35, %v265_v20  ;;  %v291_v40 = vmul.f32 %v290_v36, %v286_v21 }
  0x49   : > { %v303_v41 = vmul.f32 %v302_v37, %v286_v21 }
  0x4a   : > { %v271_v42 = vadd.f32 -5.6925062e-05, %v270_v38  ;;  %v283_v43 = vadd.f32 -0.0073733293, %v282_v39  ;;  %v292_v44 = vadd.f32 -5.6925062e-05, %v291_v40 }
  0x4b   : > { %v304_v45 = vadd.f32 -0.0073733293, %v303_v41 }
  0x4c   : > { %v272_v46 = vmul.f32 %v271_v42, %v265_v20  ;;  %v284_v47 = vmul.f32 %v283_v43, %v265_v20  ;;  %v293_v48 = vmul.f32 %v292_v44, %v286_v21 }
  0x4d   : > { %v305_v49 = vmul.f32 %v304_v45, %v286_v21 }
  0x4e   : > { %v273_v50 = vadd.f32 -0.00073499064, %v272_v46  ;;  %v285_v51 = vadd.f32 -0.014264739, %v284_v47  ;;  %v294_v52 = vadd.f32 -0.00073499064, %v293_v48 }
  0x4f   : > { %v306_v53 = vadd.f32 -0.014264739, %v305_v49 }
  0x50   : > { %v274_v54 = vmul.f32 %v273_v50, %v265_v20  ;;  %v295_v55 = vmul.f32 %v294_v52, %v286_v21 }
  0x51   : > { %v312_v56 = vmul.f32 %v306_v53, %v285_v51 }
  0x52   : > { %v275_v57 = vadd.f32 -0.0029546, %v274_v54  ;;  %v296_v58 = vadd.f32 -0.0029546, %v295_v55 }
  0x53   : > { %451 = vrcp.f32 %v312_v56 }
  0x54   : > { %v276_v59 = vmul.f32 %v275_v57, %v265_v20  ;;  %v297_v60 = vmul.f32 %v296_v58, %v286_v21 }
  0x56   : > { %v277_v61 = vadd.f32 -0.016096033, %v276_v59  ;;  %v298_v62 = vadd.f32 -0.016096033, %v297_v60 }
  0x58   : > { %v307_v63 = vmul.f32 %v426_v18, %v277_v61  ;;  %v309_v0 = vmul.f32 %v427_v19, %v298_v62 }
  0x5a   : > { %v308_v1 = vmul.f32 %v307_v63, %v306_v53  ;;  %v310_v2 = vmul.f32 %v309_v0, %v285_v51 }
  0x5c   : > { %v311_v5 = vsub.f32 %v308_v1, %v310_v2 }
  0x5d   : > { %v452_v3 = vpop.eup %451 }
  0x5e   : > { %v314_v4 = vmul.f32 %v452_v3, %v312_v56 }
  0x60   : > { %v315_v6 = vsub.f32 2.0, %v314_v4 }
  0x62   : > { %v316_v7 = vmul.f32 %v452_v3, %v315_v6 }
  0x64   : > { %v317_v8 = vmul.f32 %v316_v7, %v311_v5 }
  0x66   : > { %v318_v9 = vmax.f32 %v317_v8, 2e-06 }
  0x68   : > { %453 = vlog2.f32 %v318_v9 }
  0x72   : > { %v454_v10 = vpop.eup %453 }
  0x73   : > { %v320_v11 = vmul.f32 0.6931472, %v454_v10 }
  0x75   : > { %v322_v12 = vmul.f32 1.442695, %v320_v11 }
  0x77   : > { %v323_v13 = vsub.f32 1.0, %v322_v12 }
  0x79   : > { %324 = vst [vmem:[%s240_s11] sm:$0xff] %v323_v13 }
  0x7a PF: > { %s15_s15 = sadd.s32 1, %s480_s15  }
  0x7b   : > { %p12_p1 = scmp.ge.s32.totalorder %s15_s15, 4  }
  0x7d   :  { %14 = sbr.rel (!%p12_p1) target bundleno = 1 (0x1), region = 77 }
  0x84   :  { %344 = vsyncpa [#allocation3], 1 }
  0x85   :  { %346 = vsyncpa [#allocation3 + $0x1], 1 }

</bundles_post_ra>
